<compile_context>
chip_gen: v7x
topology: tpu7x:2x2x1
jax: 0.10.0
libtpu: 0.0.40
codegen_flags: <defaults>
</compile_context>

<pallas_src>
import functools
import math

import jax
import jax.numpy as jnp
from jax.experimental import pallas as pl
from jax.experimental.pallas import tpu as pltpu


# ----------------------------- helpers ------------------------------


def _pick(dim, candidates):
    """Largest candidate tile that evenly divides `dim`, else the full dim."""
    for c in candidates:
        if dim % c == 0:
            return c
    return dim


def _vmem_limit(*byte_counts):
    """Explicit scoped-VMEM budget (>= 32 MiB default, sized from the actual tiles)."""
    need = int(sum(byte_counts)) + (2 << 20)
    return max(need, 32 << 20)


# ----------------------------- Pallas kernels ------------------------------


def _linear_kernel(x_ref, w_ref, b_ref, o_ref, *, activation):
    """y = act(x @ W + b) with the full weight resident in VMEM. Grid = (M/tm,)."""
    y = jnp.dot(x_ref[...], w_ref[...], preferred_element_type=jnp.float32)
    y = y + b_ref[...]
    if activation == "relu":
        y = jnp.maximum(y, 0.0)
    elif activation == "gelu":
        # exact erf-GELU (matches HF DistilBERT)
        y = 0.5 * y * (1.0 + jax.lax.erf(y * 0.7071067811865476))
    o_ref[...] = y.astype(o_ref.dtype)


def _linear_add_ln_kernel(x_ref, w_ref, b_ref, r_ref, g_ref, bb_ref, o_ref, *, eps):
    """LN((x @ W + b) + residual), full weight resident. Grid = (M/tm,)."""
    y = jnp.dot(x_ref[...], w_ref[...], preferred_element_type=jnp.float32)
    y = y + b_ref[...] + r_ref[...].astype(jnp.float32)
    mean = jnp.mean(y, axis=-1, keepdims=True)
    yc = y - mean
    var = jnp.mean(yc * yc, axis=-1, keepdims=True)
    yn = yc * jax.lax.rsqrt(var + eps)
    o_ref[...] = (yn * g_ref[...] + bb_ref[...]).astype(o_ref.dtype)


def _ln_kernel(x_ref, g_ref, b_ref, o_ref, *, eps):
    """LayerNorm over last dim (no residual)."""
    x = x_ref[...].astype(jnp.float32)
    mean = jnp.mean(x, axis=-1, keepdims=True)
    xc = x - mean
    var = jnp.mean(xc * xc, axis=-1, keepdims=True)
    xn = xc * jax.lax.rsqrt(var + eps)
    o_ref[...] = (xn * g_ref[...] + b_ref[...]).astype(o_ref.dtype)


def _attn_kernel(q_ref, k_ref, v_ref, m_ref, o_ref, *,
                 heads_per_group, head_dim, scale):
    """One (batch, head-group) block: Q/K/V blocks are [1, S, GH] with GH lane-aligned."""
    mask = m_ref[0].astype(jnp.float32)          # [1, S], 1 = keep, 0 = pad
    bias = jnp.where(mask > 0.0, 0.0, -1e30)     # finite; fully-padded rows give a
                                                 # uniform softmax and are discarded later
    for h in range(heads_per_group):
        sl = pl.ds(h * head_dim, head_dim)
        q = q_ref[0, :, sl]                      # bf16 [S, hd]  (ref slice, no full-tile load)
        k = k_ref[0, :, sl]
        v = v_ref[0, :, sl]
        # contract last dims directly -> no materialized k.T (keeps XLU free for reductions)
        s = jax.lax.dot_general(q, k, (((1,), (1,)), ((), ())),
                                preferred_element_type=jnp.float32)
        s = s * scale + bias
        s = s - jnp.max(s, axis=-1, keepdims=True)
        p = jnp.exp(s)
        p = p * pl.reciprocal(jnp.sum(p, axis=-1, keepdims=True), approx=True)
        o = jnp.dot(p.astype(v.dtype), v, preferred_element_type=jnp.float32)
        o_ref[0, :, sl] = o.astype(o_ref.dtype)


# ----------------------------- kernel wrappers ------------------------------


def linear(x, w, b, activation=None, out_dtype=None):
    """y = act(x @ W + b); whole weight resident in VMEM, grid over M only."""
    M, K = x.shape
    N = w.shape[1]
    out_dtype = out_dtype or x.dtype
    tm = _pick(M, (512, 256, 128, 64, 32, 16, 8))
    limit = _vmem_limit(
        2 * tm * K * x.dtype.itemsize,              # x tile (double-buffered)
        2 * tm * N * jnp.dtype(out_dtype).itemsize, # out tile (double-buffered)
        2 * K * N * w.dtype.itemsize,               # resident weight (buffer_count copies)
        4 * tm * N,                                 # f32 intermediate
    )
    return pl.pallas_call(
        functools.partial(_linear_kernel, activation=activation),
        out_shape=jax.ShapeDtypeStruct((M, N), out_dtype),
        grid=(M // tm,),
        in_specs=[
            pl.BlockSpec((tm, K), lambda i: (i, 0)),
            pl.BlockSpec((K, N), lambda i: (0, 0)),   # resident: constant block index
            pl.BlockSpec((1, N), lambda i: (0, 0)),
        ],
        out_specs=pl.BlockSpec((tm, N), lambda i: (i, 0)),
        compiler_params=pltpu.CompilerParams(
            dimension_semantics=("parallel",), vmem_limit_bytes=limit),
    )(x, w, b.reshape(1, N))


def linear_add_ln(x, w, b, residual, gamma, beta, eps=1e-12):
    """LN((x @ W + b) + residual); whole weight resident in VMEM, grid over M only."""
    M, K = x.shape
    N = w.shape[1]
    tm = _pick(M, (512, 256, 128, 64, 32, 16, 8))
    limit = _vmem_limit(
        2 * tm * K * x.dtype.itemsize,
        2 * tm * N * residual.dtype.itemsize,       # residual tile
        2 * tm * N * residual.dtype.itemsize,       # out tile
        2 * K * N * w.dtype.itemsize,
        8 * tm * N,                                 # f32 intermediates
    )
    return pl.pallas_call(
        functools.partial(_linear_add_ln_kernel, eps=eps),
        out_shape=jax.ShapeDtypeStruct((M, N), residual.dtype),
        grid=(M // tm,),
        in_specs=[
            pl.BlockSpec((tm, K), lambda i: (i, 0)),
            pl.BlockSpec((K, N), lambda i: (0, 0)),
            pl.BlockSpec((1, N), lambda i: (0, 0)),
            pl.BlockSpec((tm, N), lambda i: (i, 0)),
            pl.BlockSpec((1, N), lambda i: (0, 0)),
            pl.BlockSpec((1, N), lambda i: (0, 0)),
        ],
        out_specs=pl.BlockSpec((tm, N), lambda i: (i, 0)),
        compiler_params=pltpu.CompilerParams(
            dimension_semantics=("parallel",), vmem_limit_bytes=limit),
    )(x, w, b.reshape(1, N), residual, gamma.reshape(1, N), beta.reshape(1, N))


def layernorm(x, gamma, beta, eps=1e-12, out_dtype=jnp.bfloat16):
    M, D = x.shape
    tm = _pick(M, (512, 256, 128, 64, 32, 16, 8))
    return pl.pallas_call(
        functools.partial(_ln_kernel, eps=eps),
        out_shape=jax.ShapeDtypeStruct((M, D), out_dtype),
        grid=(M // tm,),
        in_specs=[
            pl.BlockSpec((tm, D), lambda i: (i, 0)),
            pl.BlockSpec((1, D), lambda i: (0, 0)),
            pl.BlockSpec((1, D), lambda i: (0, 0)),
        ],
        out_specs=pl.BlockSpec((tm, D), lambda i: (i, 0)),
        compiler_params=pltpu.CompilerParams(dimension_semantics=("parallel",)),
    )(x, gamma.reshape(1, D), beta.reshape(1, D))


def attention(q, k, v, mask3, n_heads, head_dim, scale, out_dtype=jnp.bfloat16):
    """q/k/v: [B, S, D]; mask3: [B, 1, S] float (1 keep / 0 pad). Grid = (B, head-groups)."""
    B, S, D = q.shape
    if D % 128 == 0 and 128 % head_dim == 0:
        gh = 128                                  # 128-lane-aligned head-pair blocks
    else:
        gh = D                                    # small-model fallback: all heads, one group
    heads_per_group = gh // head_dim
    n_groups = D // gh
    return pl.pallas_call(
        functools.partial(_attn_kernel, heads_per_group=heads_per_group,
                          head_dim=head_dim, scale=scale),
        out_shape=jax.ShapeDtypeStruct((B, S, D), out_dtype),
        grid=(B, n_groups),
        in_specs=[
            pl.BlockSpec((1, S, gh), lambda b, g: (b, 0, g)),
            pl.BlockSpec((1, S, gh), lambda b, g: (b, 0, g)),
            pl.BlockSpec((1, S, gh), lambda b, g: (b, 0, g)),
            pl.BlockSpec((1, 1, S), lambda b, g: (b, 0, 0)),
        ],
        out_specs=pl.BlockSpec((1, S, gh), lambda b, g: (b, 0, g)),
        compiler_params=pltpu.CompilerParams(
            dimension_semantics=("parallel", "parallel")),
    )(q, k, v, mask3)


# --------------------------- model (glue + kernels) --------------------------


def init_params(key, *, vocab, max_pos, dim, n_heads, hidden_dim, n_layers, num_labels):
    std = 0.02
    keys = iter(jax.random.split(key, 8 + 8 * n_layers))
    nrm = lambda shape: (std * jax.random.normal(next(keys), shape, jnp.float32))
    bf = lambda shape: nrm(shape).astype(jnp.bfloat16)
    params = {
        "word_emb": bf((vocab, dim)),             # bf16 table: halves gather HBM traffic
        "pos_emb": bf((max_pos, dim)),
        "emb_ln_g": jnp.ones((dim,), jnp.float32),
        "emb_ln_b": jnp.zeros((dim,), jnp.float32),
        "layers": [],
        "pre_w": bf((dim, dim)),
        "pre_b": jnp.zeros((dim,), jnp.float32),
        "cls_w": bf((dim, num_labels)),
        "cls_b": jnp.zeros((num_labels,), jnp.float32),
    }
    for _ in range(n_layers):
        params["layers"].append({
            # fused QKV projection: columns [0:D]=Q, [D:2D]=K, [2D:3D]=V
            "qkv_w": bf((dim, 3 * dim)), "qkv_b": jnp.zeros((3 * dim,), jnp.float32),
            "o_w": bf((dim, dim)), "o_b": jnp.zeros((dim,), jnp.float32),
            "sa_ln_g": jnp.ones((dim,), jnp.float32),
            "sa_ln_b": jnp.zeros((dim,), jnp.float32),
            "ff1_w": bf((dim, hidden_dim)), "ff1_b": jnp.zeros((hidden_dim,), jnp.float32),
            "ff2_w": bf((hidden_dim, dim)), "ff2_b": jnp.zeros((dim,), jnp.float32),
            "out_ln_g": jnp.ones((dim,), jnp.float32),
            "out_ln_b": jnp.zeros((dim,), jnp.float32),
        })
    return params


def distilbert_wrapper_forward(params, input_ids, attention_mask, *, dim, n_heads):
    """Equivalent of DistilBertWrapper.forward for a sequence-classification model:
    returns output.logits of shape [B, num_labels] (eval mode, dropout = identity)."""
    B, S = input_ids.shape
    hd = dim // n_heads
    scale = 1.0 / math.sqrt(hd)

    # Embedding gather + positional add are JAX glue (bf16 tables); LN is a Pallas kernel.
    x = params["word_emb"][input_ids] + params["pos_emb"][jnp.arange(S)][None, :, :]
    x = x.reshape(B * S, dim)
    x = layernorm(x, params["emb_ln_g"], params["emb_ln_b"])          # bf16 [B*S, D]

    mask3 = attention_mask.astype(jnp.float32).reshape(B, 1, S)

    for lyr in params["layers"]:
        qkv = linear(x, lyr["qkv_w"], lyr["qkv_b"])                   # bf16 [B*S, 3D]
        qkv = qkv.reshape(B, S, 3 * dim)
        q, k, v = qkv[:, :, :dim], qkv[:, :, dim:2 * dim], qkv[:, :, 2 * dim:]
        ctx = attention(q, k, v, mask3, n_heads, hd, scale)           # bf16 [B, S, D]
        x = linear_add_ln(ctx.reshape(B * S, dim), lyr["o_w"], lyr["o_b"],
                          x, lyr["sa_ln_g"], lyr["sa_ln_b"])          # attn out + res + LN
        h = linear(x, lyr["ff1_w"], lyr["ff1_b"], activation="gelu")  # bf16 [B*S, FFN]
        x = linear_add_ln(h, lyr["ff2_w"], lyr["ff2_b"],
                          x, lyr["out_ln_g"], lyr["out_ln_b"])        # ff2 + res + LN

    hidden = x.reshape(B, S, dim)
    pooled = hidden[:, 0, :]                                          # CLS token [B, D]
    # Tiny [B,D]x[D,D] and [B,D]x[D,num_labels] matmuls: plain jnp (pallas_call overhead
    # would exceed the compute; also avoids masked 3-lane stores).
    pooled = jnp.dot(pooled, params["pre_w"],
                     preferred_element_type=jnp.float32) + params["pre_b"]
    pooled = jnp.maximum(pooled, 0.0)
    logits = jnp.dot(pooled.astype(jnp.bfloat16), params["cls_w"],
                     preferred_element_type=jnp.float32) + params["cls_b"]
    return logits                                                     # [B, num_labels] f32


# ---------------------------------- main -------------------------------------


if __name__ == "__main__":
    B, S = 2, 8
    VOCAB, MAX_POS = 128, 64
    DIM, HEADS, FFN, LAYERS, NUM_LABELS = 32, 4, 64, 2, 3

    key = jax.random.PRNGKey(0)
    k_param, k_ids = jax.random.split(key)

    params = init_params(k_param, vocab=VOCAB, max_pos=MAX_POS, dim=DIM,
                         n_heads=HEADS, hidden_dim=FFN, n_layers=LAYERS,
                         num_labels=NUM_LABELS)

    input_ids = jax.random.randint(k_ids, (B, S), 0, VOCAB, dtype=jnp.int32)
    # 1 = real token, 0 = padding (pad the tail of sequence 1)
    attention_mask = jnp.array(
        [[1, 1, 1, 1, 1, 1, 1, 1],
         [1, 1, 1, 1, 1, 0, 0, 0]], dtype=jnp.int32)

    logits = distilbert_wrapper_forward(params, input_ids, attention_mask,
                                        dim=DIM, n_heads=HEADS)
    logits = jax.block_until_ready(logits)
    assert logits.shape == (B, NUM_LABELS) and logits.dtype == jnp.float32
    print("KERNEL_OK")
</pallas_src>

<mosaic_0001>
module attributes {stable_mosaic.version = 11 : i64} {
  func.func @_ln_kernel(%arg0: i32, %arg1: memref<16x32xbf16, #tpu.memory_space<vmem>>, %arg2: memref<1x32xf32, #tpu.memory_space<vmem>>, %arg3: memref<1x32xf32, #tpu.memory_space<vmem>>, %arg4: memref<16x32xbf16, #tpu.memory_space<vmem>>) attributes {dimension_semantics = [#tpu.dimension_semantics<parallel>], iteration_bounds = array<i64: 1>, scalar_prefetch = 0 : i64, scratch_operands = 0 : i64, tpu.core_type = #tpu.core_type<tc>, window_params = [{transform_indices = @transform_0, window_bounds = array<i64: 16, 32>}, {pipeline_mode = #tpu.pipeline_mode<synchronous>, transform_indices = @transform_1, window_bounds = array<i64: 1, 32>}, {pipeline_mode = #tpu.pipeline_mode<synchronous>, transform_indices = @transform_2, window_bounds = array<i64: 1, 32>}, {transform_indices = @transform_3, window_bounds = array<i64: 16, 32>}]} {
    %c0 = arith.constant 0 : index
    %c0_0 = arith.constant 0 : index
    %0 = vector.load %arg1[%c0, %c0_0] : memref<16x32xbf16, #tpu.memory_space<vmem>>, vector<16x32xbf16>
    %1 = arith.extf %0 : vector<16x32xbf16> to vector<16x32xf32>
    %cst = arith.constant dense<0.000000e+00> : vector<16xf32>
    %2 = vector.multi_reduction <add>, %1, %cst [1] : vector<16x32xf32> to vector<16xf32>
    %3 = vector.shape_cast %2 : vector<16xf32> to vector<16x1xf32>
    %cst_1 = arith.constant 3.200000e+01 : f32
    %4 = vector.broadcast %cst_1 : f32 to vector<16x1xf32>
    %5 = arith.divf %3, %4 : vector<16x1xf32>
    %6 = vector.broadcast %5 : vector<16x1xf32> to vector<16x32xf32>
    %7 = arith.subf %1, %6 : vector<16x32xf32>
    %8 = arith.mulf %7, %7 : vector<16x32xf32>
    %cst_2 = arith.constant dense<0.000000e+00> : vector<16xf32>
    %9 = vector.multi_reduction <add>, %8, %cst_2 [1] : vector<16x32xf32> to vector<16xf32>
    %10 = vector.shape_cast %9 : vector<16xf32> to vector<16x1xf32>
    %cst_3 = arith.constant 3.200000e+01 : f32
    %11 = vector.broadcast %cst_3 : f32 to vector<16x1xf32>
    %12 = arith.divf %10, %11 : vector<16x1xf32>
    %cst_4 = arith.constant 9.99999996E-13 : f32
    %13 = vector.broadcast %cst_4 : f32 to vector<16x1xf32>
    %14 = arith.addf %12, %13 : vector<16x1xf32>
    %15 = math.rsqrt %14 : vector<16x1xf32>
    %16 = vector.broadcast %15 : vector<16x1xf32> to vector<16x32xf32>
    %17 = arith.mulf %7, %16 : vector<16x32xf32>
    %c0_5 = arith.constant 0 : index
    %c0_6 = arith.constant 0 : index
    %18 = vector.load %arg2[%c0_5, %c0_6] : memref<1x32xf32, #tpu.memory_space<vmem>>, vector<1x32xf32>
    %19 = vector.broadcast %18 : vector<1x32xf32> to vector<16x32xf32>
    %20 = arith.mulf %17, %19 : vector<16x32xf32>
    %c0_7 = arith.constant 0 : index
    %c0_8 = arith.constant 0 : index
    %21 = vector.load %arg3[%c0_7, %c0_8] : memref<1x32xf32, #tpu.memory_space<vmem>>, vector<1x32xf32>
    %22 = vector.broadcast %21 : vector<1x32xf32> to vector<16x32xf32>
    %23 = arith.addf %20, %22 : vector<16x32xf32>
    %24 = arith.truncf %23 : vector<16x32xf32> to vector<16x32xbf16>
    %c0_9 = arith.constant 0 : index
    %c0_10 = arith.constant 0 : index
    %25 = vector.load %arg4[%c0_9, %c0_10] : memref<16x32xbf16, #tpu.memory_space<vmem>>, vector<16x32xbf16>
    tpu.vector_store %arg4[%c0_9, %c0_10], %24 {strides = array<i32>} : memref<16x32xbf16, #tpu.memory_space<vmem>>, vector<16x32xbf16>,
    return
  }
  func.func @transform_0(%arg0: i32) -> (i32, i32) {
    %c0_i32 = arith.constant 0 : i32
    %c0_i32_0 = arith.constant 0 : i32
    return %arg0, %c0_i32 : i32, i32
  }
  func.func @transform_1(%arg0: i32) -> (i32, i32) {
    %c0_i32 = arith.constant 0 : i32
    %c0_i32_0 = arith.constant 0 : i32
    %c0_i32_1 = arith.constant 0 : i32
    return %c0_i32, %c0_i32_0 : i32, i32
  }
  func.func @transform_2(%arg0: i32) -> (i32, i32) {
    %c0_i32 = arith.constant 0 : i32
    %c0_i32_0 = arith.constant 0 : i32
    %c0_i32_1 = arith.constant 0 : i32
    return %c0_i32, %c0_i32_0 : i32, i32
  }
  func.func @transform_3(%arg0: i32) -> (i32, i32) {
    %c0_i32 = arith.constant 0 : i32
    %c0_i32_0 = arith.constant 0 : i32
    return %arg0, %c0_i32 : i32, i32
  }
}

</mosaic_0001>

<bundles_post_ra>
// kernel: tpu_custom_call.1
= control target key start
LH: loop header
LB: loop body
LE: loop exit
PB: predicated region body
PF: predicated region fallthrough
CT: control target
= control target key end

     0   :  { %8 = vsyncpa [#allocation3], 0  ;;  %s237_s0 = inlined_call_operand.hbm [shape: bf16[16,32], index: 0, kind: input, shape index: {}]   ;;  %s238_s1 = inlined_call_operand.vmem [shape: f32[1,32], index: 1, kind: input, shape index: {}]   ;;  %s239_s2 = inlined_call_operand.vmem [shape: f32[1,32], index: 2, kind: input, shape index: {}]   ;;  %s240_s3 = inlined_call_operand.hbm [shape: bf16[16,32], index: 3, kind: output, shape index: {}]  }
   0x1   :  { %9 = vsyncpa [#allocation4], 0  ;;  %s173_s12 = smov [#allocation2]   ;;  %s125_s16 = scalar_lea.hbm %s237_s0, 128 }
   0x2   :  { %s15_s13 = sshll.u32 %s173_s12, 4  ;;  %p126_p0 = scmp.ne.s32.totalorder %s237_s0, %s125_s16  ;;  %s16_s13 = int_to_ptr.vmem [resolvable:$true] %s15_s13 }
   0x3   :  { %p129_p1 = scmp.lt.u32.totalorder %s125_s16, %s237_s0 }
   0x5   :  { %p131_p2 = pnand %p129_p1, %p126_p0 }
   0x7   :  { %134 = shalt.err (!%p131_p2)
}
   0x8   :  { %s135_s21 = scalar_lea.vmem %s16_s13, 128  ;;  %p140_p4 = scmp.lt.s32.totalorder %s16_s13, %s16_s13 }
   0x9   :  { %p136_p3 = scmp.ne.s32.totalorder %s16_s13, %s135_s21  ;;  %p141_p5 = scmp.lt.s32.totalorder %s135_s21, %s135_s21 }
   0xb   :  { %p142_p6 = por %p141_p5, %p140_p4 }
   0xd   :  { %p143_p7 = pnand %p142_p6, %p136_p3 }
   0xf   :  { %146 = shalt.err (!%p143_p7)
}
  0x10   :  { %s174_s22 = smov 64   ;;  %s175_s23 = smov 4  }
  0x11   :  { %21 = dma.hbm_to_vmem [thread:$0]  %s237_s0, 128, %s16_s13, [#allocation3], %s174_s22, %s174_s22, %s175_s23  }
  0x12   :  { %169 = dma.done.wait [#allocation3], 128  }
  0x13   :  { %170 = vsyncadd [#allocation3], 4294967168  ;;  %v114_v0 = vld [vmem:[#allocation2] sm:$0xff]   ;;  %vm33_vm0 = vcmask 261120   ;;  %vm87_vm1 = vcmask 257024   ;;  %s176_s29 = smov [#allocation5]  }
  0x14   :  { %v115_v1 = vunpack.c.l.bf16 %v114_v0  ;;  %v116_v2 = vunpack.c.h.bf16 %v114_v0  ;;  %v107_v22 = vld [vmem:[%s238_s1] ss:$0 sm:$0xff]  ;;  %s95_s30 = sshll.u32 %s176_s29, 4  ;;  %s96_s30 = int_to_ptr.vmem [resolvable:$true] %s95_s30 }
  0x15   :  { %v108_v24 = vld [vmem:[%s239_s2] ss:$0 sm:$0xff]  ;;  %s147_s1 = scalar_lea.vmem %s96_s30, 128  ;;  %p152_p9 = scmp.lt.s32.totalorder %s96_s30, %s96_s30 }
  0x16   :  { %v34_v3 = vsel %vm33_vm0, %v115_v1, 0.0  ;;  %v37_v4 = vsel %vm33_vm0, %v116_v2, 0.0  ;;  %p148_p8 = scmp.ne.s32.totalorder %s96_s30, %s147_s1  ;;  %p153_p10 = scmp.lt.s32.totalorder %s147_s1, %s147_s1 }
  0x17   :  { %35 = vadd.xlane.f32.xlu0 %v34_v3 }
  0x18   :  { %p154_p11 = por %p153_p10, %p152_p9 }
  0x1a   :  { %p155_p12 = pnand %p154_p11, %p148_p8 }
  0x1b   :  { %38 = vadd.xlane.f32.xlu0 %v37_v4 }
  0xa4   :  { %v36_v5 = vpop.xlane.xlu0 %35 }
  0xa5   :  { %v41_v6 = vmul.f32 0.03125, %v36_v5 }
  0xa7   :  { %v43_v7 = vsub.f32 %v115_v1, %v41_v6 }
  0xa8   :  { %v39_v8 = vpop.xlane.xlu0 %38 }
  0xa9   :  { %v42_v9 = vmul.f32 0.03125, %v39_v8  ;;  %v45_v10 = vmul.f32 %v43_v7, %v43_v7 }
  0xab   :  { %v44_v11 = vsub.f32 %v116_v2, %v42_v9  ;;  %v47_v12 = vsel %vm33_vm0, %v45_v10, 0.0 }
  0xac   :  { %48 = vadd.xlane.f32.xlu1 %v47_v12 }
  0xad   :  { %v46_v13 = vmul.f32 %v44_v11, %v44_v11 }
  0xaf   :  { %v50_v14 = vsel %vm33_vm0, %v46_v13, 0.0 }
  0xb0   :  { %51 = vadd.xlane.f32.xlu1 %v50_v14 }
 0x139   :  { %v49_v15 = vpop.xlane.xlu1 %48 }
 0x13a   :  { %v53_v16 = vmul.f32 0.03125, %v49_v15 }
 0x13c   :  { %v55_v17 = vadd.f32 1e-12, %v53_v16 }
 0x13d   :  { %v52_v18 = vpop.xlane.xlu1 %51 }
 0x13e   :  { %121 = vrsqrt.f32 %v55_v17  ;;  %v54_v19 = vmul.f32 0.03125, %v52_v18 }
 0x140   :  { %v56_v20 = vadd.f32 1e-12, %v54_v19 }
 0x142   :  { %123 = vrsqrt.f32 %v56_v20 }
 0x148   :  { %v122_v21 = vpop.eup %121 }
 0x149   :  { %v59_v23 = vmul.f32 %v122_v21, %v43_v7 }
 0x14b   :  { %v68_v25 = vmul.f32 %v107_v22, %v59_v23 }
 0x14c   :  { %v124_v26 = vpop.eup %123 }
 0x14d   :  { %v60_v27 = vmul.f32 %v124_v26, %v44_v11  ;;  %v77_v28 = vadd.f32 %v108_v24, %v68_v25 }
 0x14f   :  { %v69_v29 = vmul.f32 %v107_v22, %v60_v27  ;;  %v111_v30 = vpack.c.bf16 %v77_v28, %v77_v28 }
 0x151   :  { %v78_v31 = vadd.f32 %v108_v24, %v69_v29  ;;  %88 = vst.msk [vmem:[#allocation5] sm:$0xf] %vm87_vm1, %v111_v30 }
 0x153   :  { %v112_v32 = vpack.c.bf16 %v78_v31, %v78_v31 }
 0x155   :  { %89 = vst.msk [vmem:[#allocation5 + $0x4] sm:$0xf] %vm87_vm1, %v112_v32 }
 0x156   :  { %158 = shalt.err (!%p155_p12)
}
 0x157   :  { %s159_s5 = scalar_lea.hbm %s240_s3, 128 }
 0x158   :  { %p160_p13 = scmp.ne.s32.totalorder %s240_s3, %s159_s5  ;;  %p163_p0 = scmp.lt.u32.totalorder %s159_s5, %s240_s3 }
 0x15a   :  { %p165_p1 = pnand %p163_p0, %p160_p13 }
 0x15c   :  { %168 = shalt.err (!%p165_p1)
}
 0x15d   :  { %101 = dma.vmem_to_hbm [thread:$0]  %s96_s30, 128, %s240_s3, [#allocation4], %s174_s22, %s174_s22, %s175_s23  }
 0x15e   :  { %171 = dma.done.wait [#allocation4], 128  }
 0x15f   :  { %172 = vsyncadd [#allocation4], 4294967168 }
 0x160   :  { %105 = vsyncpa [#allocation3], 1 }
 0x161   :  { %106 = vsyncpa [#allocation4], 1 }

</bundles_post_ra>
